<compile_context>
chip_gen: v7x
topology: tpu7x:2x2x1
jax: 0.10.0
libtpu: 0.0.40
codegen_flags: <defaults>
</compile_context>

<pallas_src>
import functools

import jax
import jax.numpy as jnp
from jax.experimental import pallas as pl
from jax.experimental.pallas import tpu as pltpu


def _round_up(x, m):
    return (x + m - 1) // m * m


def _sublane_tile(dtype):
    # rows per packed sublane tile for a given element width
    return {4: 8, 2: 16, 1: 32}[jnp.dtype(dtype).itemsize]


# --------------------------------------------------------------------------
# Kernel
# --------------------------------------------------------------------------
def _sgnet_kernel(s_ref, a_ref, w_ref, b_ref, out_ref, *,
                  in_size, out_size, in_p, out_p, lw,
                  off_w1s, off_w1a, off_w2, off_w3):
    """One batch tile: out = (relu(relu(s@W1s + a@W1a + b1)@W2 + b2))@W3 + b3."""
    dt = w_ref.dtype
    tb = s_ref.shape[0]

    s = s_ref[...].astype(dt)                       # (TB, in_size)
    a = a_ref[...].astype(dt)                       # (TB, out_size)
    # Lane-pad activations only when the weight segment is row-padded
    # (bf16/int8 alignment); the extra weight rows are zero so this is exact.
    if in_p != in_size:
        s = jnp.concatenate([s, jnp.zeros((tb, in_p - in_size), dt)], axis=1)
    if out_p != out_size:
        a = jnp.concatenate([a, jnp.zeros((tb, out_p - out_size), dt)], axis=1)

    # All weight-segment starts are sublane-tile aligned -> zero-cost views.
    w1s = w_ref[off_w1s:off_w1s + in_p, :]          # (in_p, lw)  fc11^T
    w1a = w_ref[off_w1a:off_w1a + out_p, :]         # (out_p, lw) fc12^T
    w2 = w_ref[off_w2:off_w2 + lw, :]               # (lw, lw)    fc2^T (zero padded)
    w3 = w_ref[off_w3:off_w3 + lw, :]               # (lw, lw)    fc3^T (zero padded)
    b1 = b_ref[0:1, :]                              # (1, lw) f32
    b2 = b_ref[1:2, :]
    b3 = b_ref[2:3, :]

    # layer 1: fused fc11/fc12 + concat (block-diagonal columns of W1s/W1a).
    h1 = jnp.maximum(
        jnp.dot(s, w1s, preferred_element_type=jnp.float32)
        + jnp.dot(a, w1a, preferred_element_type=jnp.float32) + b1, 0.0)
    # layer 2: fc2 + relu
    h2 = jnp.maximum(
        jnp.dot(h1.astype(dt), w2, preferred_element_type=jnp.float32) + b2, 0.0)
    # layer 3: fc3 -> store only the real out_size columns (narrow output).
    y = jnp.dot(h2.astype(dt), w3, preferred_element_type=jnp.float32) + b3
    out_ref[...] = y[:, :out_size].astype(out_ref.dtype)


# --------------------------------------------------------------------------
# One-time parameter packing (hoisted out of the per-call path)
# --------------------------------------------------------------------------
def _pack_params(params, dtype):
    w11, b11, w12, b12, w2, b2, w3, b3 = [jnp.asarray(p, jnp.float32) for p in params]
    h11 = w11.shape[0]                 # fc11 out features
    h12 = w12.shape[0]                 # fc12 out features
    hcat = h11 + h12                   # fc2 in features (== w2.shape[1])
    hmid = w2.shape[0]                 # fc2 out features
    in_size = w11.shape[1]
    out_size = w3.shape[0]
    assert w2.shape[1] == hcat, "fc2 input width must equal fc11+fc12 outputs"
    assert w3.shape[1] == hmid, "fc3 input width must equal fc2 outputs"

    sub = _sublane_tile(dtype)                       # 8 (f32) / 16 (bf16) / 32 (8-bit)
    lw = max(128, _round_up(max(hcat, hmid, out_size), 128))   # lane-dense hidden width
    in_p = _round_up(in_size, sub)
    out_p = _round_up(out_size, sub)

    # sublane-tile-aligned row offsets for every segment of the pack
    off_w1s = 0
    off_w1a = off_w1s + in_p
    off_w2 = off_w1a + out_p
    off_w3 = off_w2 + lw
    total = off_w3 + lw

    wpack = jnp.zeros((total, lw), jnp.float32)
    wpack = wpack.at[off_w1s:off_w1s + in_size, :h11].set(w11.T)
    wpack = wpack.at[off_w1a:off_w1a + out_size, h11:hcat].set(w12.T)
    wpack = wpack.at[off_w2:off_w2 + hcat, :hmid].set(w2.T)
    wpack = wpack.at[off_w3:off_w3 + hmid, :out_size].set(w3.T)
    wpack = wpack.astype(dtype)                                  # (total, lw)

    bpack = jnp.zeros((3, lw), jnp.float32)
    bpack = bpack.at[0, :hcat].set(jnp.concatenate([b11, b12]))
    bpack = bpack.at[1, :hmid].set(b2)
    bpack = bpack.at[2, :out_size].set(b3)                        # (3, lw) f32

    meta = dict(in_size=in_size, out_size=out_size, in_p=in_p, out_p=out_p, lw=lw,
                off_w1s=off_w1s, off_w1a=off_w1a, off_w2=off_w2, off_w3=off_w3)
    return wpack, bpack, meta


def make_sgnet_forward(params, param_dtype=jnp.float32, out_dtype=jnp.float32,
                       max_batch_tile=1024, small_batch_threshold=256):
    """Pack params once; return a jitted forward(a, s) -> (B, output_size)."""
    params_f32 = tuple(jnp.asarray(p, jnp.float32) for p in params)
    wpack, bpack, meta = _pack_params(params_f32, param_dtype)
    kernel = functools.partial(_sgnet_kernel, **meta)
    in_size, out_size = meta["in_size"], meta["out_size"]
    row_align = max(8, _sublane_tile(param_dtype))   # batch-tile row alignment
    (w11, b11, w12, b12, w2, b2, w3, b3) = params_f32

    @jax.jit
    def forward(a, s):
        assert s.ndim == 2 and a.ndim == 2 and s.shape[0] == a.shape[0]
        assert s.shape[1] == in_size and a.shape[1] == out_size
        B = s.shape[0]

        # Tiny batches are dispatch/wrapper dominated: fused XLA dots win.
        if B < small_batch_threshold:
            s1 = jax.nn.relu(s @ w11.T + b11)
            a1 = jax.nn.relu(a @ w12.T + b12)
            x = jnp.concatenate([s1, a1], axis=1)
            return (jax.nn.relu(x @ w2.T + b2) @ w3.T + b3).astype(out_dtype)

        # Tile the batch so the grid has >= 2 steps when possible (v7x megacore),
        # capped at max_batch_tile. Per-step VMEM stays tiny on every generation.
        half = _round_up(pl.cdiv(B, 2), row_align)
        tb = min(max_batch_tile, max(row_align, half), _round_up(B, row_align))
        grid = (pl.cdiv(B, tb),)

        return pl.pallas_call(
            kernel,
            out_shape=jax.ShapeDtypeStruct((B, out_size), out_dtype),
            grid=grid,
            in_specs=[
                # activations stream through batch tiles (double-buffered)
                pl.BlockSpec((tb, in_size), lambda i: (i, 0)),
                pl.BlockSpec((tb, out_size), lambda i: (i, 0)),
                # packed weights / biases: constant index map -> VMEM resident
                # TODO(synk): could single-buffer these (pipeline_mode), but
                # VMEM is nowhere near tight at these sizes.
                pl.BlockSpec(wpack.shape, lambda i: (0, 0)),
                pl.BlockSpec(bpack.shape, lambda i: (0, 0)),
            ],
            out_specs=pl.BlockSpec((tb, out_size), lambda i: (i, 0)),
            compiler_params=pltpu.CompilerParams(
                dimension_semantics=("parallel",)),
        )(s, a, wpack, bpack)

    return forward


# --------------------------------------------------------------------------
# Init + pure-JAX reference
# --------------------------------------------------------------------------
def init_params(key, input_size, output_size):
    """Deterministic init matching PyTorch Linear shapes: W is (out, in)."""
    def linear(key, fan_in, fan_out):
        kw, kb = jax.random.split(key)
        bound = 1.0 / jnp.sqrt(fan_in)
        w = jax.random.uniform(kw, (fan_out, fan_in), jnp.float32, -bound, bound)
        b = jax.random.uniform(kb, (fan_out,), jnp.float32, -bound, bound)
        return w, b

    k11, k12, k2, k3 = jax.random.split(key, 4)
    w11, b11 = linear(k11, input_size, 40)     # fc11
    w12, b12 = linear(k12, output_size, 40)    # fc12
    w2, b2 = linear(k2, 80, 40)                # fc2
    w3, b3 = linear(k3, 40, output_size)       # fc3
    return (w11, b11, w12, b12, w2, b2, w3, b3)


def sgnet_reference(a, s, params):
    """Pure-JAX reference of the PyTorch forward."""
    (w11, b11, w12, b12, w2, b2, w3, b3) = params
    s1 = jax.nn.relu(s @ w11.T + b11)
    a1 = jax.nn.relu(a @ w12.T + b12)
    x = jnp.concatenate([s1, a1], axis=1)
    return jax.nn.relu(x @ w2.T + b2) @ w3.T + b3


if __name__ == "__main__":
    input_size = 16    # game.input_size  (state dim)
    output_size = 8    # game.output_size (action dim)
    batch = 2

    key = jax.random.PRNGKey(0)
    kp, ks, ka = jax.random.split(key, 3)

    params = init_params(kp, input_size, output_size)
    s = jax.random.normal(ks, (batch, input_size), jnp.float32)
    a = jax.random.normal(ka, (batch, output_size), jnp.float32)
    ref = sgnet_reference(a, s, params)

    # (1) Pallas kernel forced on the small batch (threshold=0).
    forward_force = make_sgnet_forward(params, small_batch_threshold=0)
    out = jax.block_until_ready(forward_force(a, s))
    assert out.shape == (batch, output_size)
    assert jnp.allclose(out, ref, atol=1e-5, rtol=1e-5), "f32 Pallas mismatch (B=2)"

    # (2) Default forward: small-batch XLA bypass path.
    forward = make_sgnet_forward(params)
    out_bypass = jax.block_until_ready(forward(a, s))
    assert jnp.allclose(out_bypass, ref, atol=1e-5, rtol=1e-5), "bypass mismatch (B=2)"

    # (3) Larger batch through the Pallas path: >= 2 grid steps + partial last tile.
    ks2, ka2 = jax.random.split(jax.random.PRNGKey(1))
    big_b = 1303
    s2 = jax.random.normal(ks2, (big_b, input_size), jnp.float32)
    a2 = jax.random.normal(ka2, (big_b, output_size), jnp.float32)
    out2 = jax.block_until_ready(forward(a2, s2))
    ref2 = sgnet_reference(a2, s2, params)
    assert out2.shape == (big_b, output_size)
    assert jnp.allclose(out2, ref2, atol=1e-4, rtol=1e-4), "gridded f32 mismatch"

    # (4) bf16 weight path (v6e/v7x; 16-row-aligned pack offsets), f32 accumulation.
    forward_bf16 = make_sgnet_forward(params, param_dtype=jnp.bfloat16,
                                      small_batch_threshold=0)
    ks3, ka3 = jax.random.split(jax.random.PRNGKey(2))
    s3 = jax.random.normal(ks3, (512, input_size), jnp.float32)
    a3 = jax.random.normal(ka3, (512, output_size), jnp.float32)
    out3 = jax.block_until_ready(forward_bf16(a3, s3))
    ref3 = sgnet_reference(a3, s3, params)
    assert jnp.allclose(out3, ref3, atol=5e-2, rtol=5e-2), "bf16 mismatch vs reference"

    print("KERNEL_OK")
</pallas_src>

<mosaic_0001>
module attributes {stable_mosaic.version = 11 : i64} {
  func.func @_sgnet_kernel(%arg0: i32, %arg1: memref<8x16xf32, #tpu.memory_space<vmem>>, %arg2: memref<8x8xf32, #tpu.memory_space<vmem>>, %arg3: memref<280x128xf32, #tpu.memory_space<vmem>>, %arg4: memref<3x128xf32, #tpu.memory_space<vmem>>, %arg5: memref<8x8xf32, #tpu.memory_space<vmem>>) attributes {dimension_semantics = [#tpu.dimension_semantics<parallel>], iteration_bounds = array<i64: 1>, scalar_prefetch = 0 : i64, scratch_operands = 0 : i64, tpu.core_type = #tpu.core_type<tc>, window_params = [{transform_indices = @transform_0, window_bounds = array<i64: 8, 16>}, {transform_indices = @transform_1, window_bounds = array<i64: 8, 8>}, {pipeline_mode = #tpu.pipeline_mode<synchronous>, transform_indices = @transform_2, window_bounds = array<i64: 280, 128>}, {pipeline_mode = #tpu.pipeline_mode<synchronous>, transform_indices = @transform_3, window_bounds = array<i64: 3, 128>}, {transform_indices = @transform_4, window_bounds = array<i64: 8, 8>}]} {
    %c0 = arith.constant 0 : index
    %c0_0 = arith.constant 0 : index
    %0 = vector.load %arg1[%c0, %c0_0] : memref<8x16xf32, #tpu.memory_space<vmem>>, vector<8x16xf32>
    %c0_1 = arith.constant 0 : index
    %c0_2 = arith.constant 0 : index
    %1 = vector.load %arg2[%c0_1, %c0_2] : memref<8x8xf32, #tpu.memory_space<vmem>>, vector<8x8xf32>
    %c0_3 = arith.constant 0 : index
    %c0_4 = arith.constant 0 : index
    %2 = vector.load %arg3[%c0_3, %c0_4] : memref<280x128xf32, #tpu.memory_space<vmem>>, vector<16x128xf32>
    %c16 = arith.constant 16 : index
    %c0_5 = arith.constant 0 : index
    %3 = vector.load %arg3[%c16, %c0_5] : memref<280x128xf32, #tpu.memory_space<vmem>>, vector<8x128xf32>
    %c24 = arith.constant 24 : index
    %c0_6 = arith.constant 0 : index
    %4 = vector.load %arg3[%c24, %c0_6] : memref<280x128xf32, #tpu.memory_space<vmem>>, vector<128x128xf32>
    %c152 = arith.constant 152 : index
    %c0_7 = arith.constant 0 : index
    %5 = vector.load %arg3[%c152, %c0_7] : memref<280x128xf32, #tpu.memory_space<vmem>>, vector<128x128xf32>
    %c0_8 = arith.constant 0 : index
    %c0_9 = arith.constant 0 : index
    %6 = vector.load %arg4[%c0_8, %c0_9] : memref<3x128xf32, #tpu.memory_space<vmem>>, vector<1x128xf32>
    %c1 = arith.constant 1 : index
    %c0_10 = arith.constant 0 : index
    %7 = vector.load %arg4[%c1, %c0_10] : memref<3x128xf32, #tpu.memory_space<vmem>>, vector<1x128xf32>
    %c2 = arith.constant 2 : index
    %c0_11 = arith.constant 0 : index
    %8 = vector.load %arg4[%c2, %c0_11] : memref<3x128xf32, #tpu.memory_space<vmem>>, vector<1x128xf32>
    %cst = arith.constant dense<0.000000e+00> : vector<8x128xf32>
    %9 = tpu.matmul %0, %2, %cst {dimension_numbers = #tpu.dot_dimension_numbers<[1], [0], [0], [1], [0, 0, 1, 1], [], []>} : vector<8x16xf32>, vector<16x128xf32>, vector<8x128xf32> -> vector<8x128xf32>
    %cst_12 = arith.constant dense<0.000000e+00> : vector<8x128xf32>
    %10 = tpu.matmul %1, %3, %cst_12 {dimension_numbers = #tpu.dot_dimension_numbers<[1], [0], [0], [1], [0, 0, 1, 1], [], []>} : vector<8x8xf32>, vector<8x128xf32>, vector<8x128xf32> -> vector<8x128xf32>
    %11 = arith.addf %9, %10 : vector<8x128xf32>
    %12 = vector.broadcast %6 : vector<1x128xf32> to vector<8x128xf32>
    %13 = arith.addf %11, %12 : vector<8x128xf32>
    %cst_13 = arith.constant 0.000000e+00 : f32
    %14 = vector.broadcast %cst_13 : f32 to vector<8x128xf32>
    %15 = arith.maximumf %13, %14 : vector<8x128xf32>
    %cst_14 = arith.constant dense<0.000000e+00> : vector<8x128xf32>
    %16 = tpu.matmul %15, %4, %cst_14 {dimension_numbers = #tpu.dot_dimension_numbers<[1], [0], [0], [1], [0, 0, 1, 1], [], []>} : vector<8x128xf32>, vector<128x128xf32>, vector<8x128xf32> -> vector<8x128xf32>
    %17 = vector.broadcast %7 : vector<1x128xf32> to vector<8x128xf32>
    %18 = arith.addf %16, %17 : vector<8x128xf32>
    %cst_15 = arith.constant 0.000000e+00 : f32
    %19 = vector.broadcast %cst_15 : f32 to vector<8x128xf32>
    %20 = arith.maximumf %18, %19 : vector<8x128xf32>
    %cst_16 = arith.constant dense<0.000000e+00> : vector<8x128xf32>
    %21 = tpu.matmul %20, %5, %cst_16 {dimension_numbers = #tpu.dot_dimension_numbers<[1], [0], [0], [1], [0, 0, 1, 1], [], []>} : vector<8x128xf32>, vector<128x128xf32>, vector<8x128xf32> -> vector<8x128xf32>
    %22 = vector.broadcast %8 : vector<1x128xf32> to vector<8x128xf32>
    %23 = arith.addf %21, %22 : vector<8x128xf32>
    %24 = vector.extract_strided_slice %23 {offsets = [0, 0], sizes = [8, 8], strides = [1, 1]} : vector<8x128xf32> to vector<8x8xf32>
    %c0_17 = arith.constant 0 : index
    %c0_18 = arith.constant 0 : index
    %25 = vector.load %arg5[%c0_17, %c0_18] : memref<8x8xf32, #tpu.memory_space<vmem>>, vector<8x8xf32>
    tpu.vector_store %arg5[%c0_17, %c0_18], %24 {strides = array<i32>} : memref<8x8xf32, #tpu.memory_space<vmem>>, vector<8x8xf32>,
    return
  }
  func.func @transform_0(%arg0: i32) -> (i32, i32) {
    %c0_i32 = arith.constant 0 : i32
    %c0_i32_0 = arith.constant 0 : i32
    return %arg0, %c0_i32 : i32, i32
  }
  func.func @transform_1(%arg0: i32) -> (i32, i32) {
    %c0_i32 = arith.constant 0 : i32
    %c0_i32_0 = arith.constant 0 : i32
    return %arg0, %c0_i32 : i32, i32
  }
  func.func @transform_2(%arg0: i32) -> (i32, i32) {
    %c0_i32 = arith.constant 0 : i32
    %c0_i32_0 = arith.constant 0 : i32
    %c0_i32_1 = arith.constant 0 : i32
    return %c0_i32, %c0_i32_0 : i32, i32
  }
  func.func @transform_3(%arg0: i32) -> (i32, i32) {
    %c0_i32 = arith.constant 0 : i32
    %c0_i32_0 = arith.constant 0 : i32
    %c0_i32_1 = arith.constant 0 : i32
    return %c0_i32, %c0_i32_0 : i32, i32
  }
  func.func @transform_4(%arg0: i32) -> (i32, i32) {
    %c0_i32 = arith.constant 0 : i32
    %c0_i32_0 = arith.constant 0 : i32
    return %arg0, %c0_i32 : i32, i32
  }
}

</mosaic_0001>

<bundles_post_ra>
// kernel: forward.1
= control target key start
LH: loop header
LB: loop body
LE: loop exit
PB: predicated region body
PF: predicated region fallthrough
CT: control target
= control target key end

     0   :  { %9 = vsyncpa [#allocation3], 0  ;;  %s779_s0 = inlined_call_operand.vmem [shape: f32[2,16], index: 0, kind: input, shape index: {}]   ;;  %s780_s1 = inlined_call_operand.hbm [shape: f32[2,8], index: 1, kind: input, shape index: {}]   ;;  %s781_s2 = inlined_call_operand.hbm [shape: f32[280,128], index: 2, kind: input, shape index: {}]   ;;  %s782_s3 = inlined_call_operand.vmem [shape: f32[3,128], index: 3, kind: input, shape index: {}]   ;;  %s783_s4 = inlined_call_operand.hbm [shape: f32[2,8], index: 4, kind: output, shape index: {}]  }
   0x1   :  { %10 = vsyncpa [#allocation6], 0 }
   0x2   :  { %11 = vsyncpa [#allocation4], 0 }
   0x3   :  { %18 = vsyncadd [#allocation3], 96  ;;  %s667_s15 = smov [#allocation2]   ;;  %s595_s19 = scalar_lea.hbm %s780_s1, 32 }
   0x4   :  { %s19_s16 = sshll.u32 %s667_s15, 4  ;;  %p596_p0 = scmp.ne.s32.totalorder %s780_s1, %s595_s19  ;;  %s20_s16 = int_to_ptr.vmem [resolvable:$true] %s19_s16 }
   0x5   :  { %p599_p1 = scmp.lt.u32.totalorder %s595_s19, %s780_s1 }
   0x7   :  { %p601_p2 = pnand %p599_p1, %p596_p0 }
   0x9   :  { %604 = shalt.err (!%p601_p2)
}
   0xa   :  { %s605_s24 = scalar_lea.vmem %s20_s16, 32  ;;  %s609_s25 = scalar_lea.vmem %s20_s16, 128 }
   0xb   :  { %p606_p3 = scmp.ne.s32.totalorder %s20_s16, %s605_s24  ;;  %p610_p4 = scmp.lt.s32.totalorder %s20_s16, %s20_s16 }
   0xc   :  { %p611_p5 = scmp.lt.s32.totalorder %s609_s25, %s605_s24 }
   0xe   :  { %p612_p6 = por %p611_p5, %p610_p4 }
  0x10   :  { %p613_p7 = pnand %p612_p6, %p606_p3 }
  0x12   :  { %616 = shalt.err (!%p613_p7)
}
  0x13   :  { %s668_s26 = smov 32   ;;  %s669_s27 = smov 2  }
  0x14   :  { %25 = dma.hbm_to_vmem [thread:$0]  %s780_s1, 32, %s20_s16, [#allocation3], %s668_s26, %s668_s26, %s669_s27  }
  0x15   :  { %s670_s30 = smov [#allocation5]   ;;  %s617_s8 = scalar_lea.hbm %s781_s2, 4480 }
  0x16   :  { %s31_s5 = sshll.u32 %s670_s30, 4  ;;  %p618_p8 = scmp.ne.s32.totalorder %s781_s2, %s617_s8  ;;  %s32_s5 = int_to_ptr.vmem [resolvable:$true] %s31_s5 }
  0x17   :  { %p621_p9 = scmp.lt.u32.totalorder %s617_s8, %s781_s2 }
  0x19   :  { %p623_p10 = pnand %p621_p9, %p618_p8 }
  0x1b   :  { %626 = shalt.err (!%p623_p10)
}
  0x1c   :  { %s627_s13 = scalar_lea.vmem %s32_s5, 4480  ;;  %p632_p12 = scmp.lt.s32.totalorder %s32_s5, %s32_s5 }
  0x1d   :  { %p628_p11 = scmp.ne.s32.totalorder %s32_s5, %s627_s13  ;;  %p633_p13 = scmp.lt.s32.totalorder %s627_s13, %s627_s13 }
  0x1f   :  { %p634_p0 = por %p633_p13, %p632_p12 }
  0x21   :  { %p635_p1 = pnand %p634_p0, %p628_p11 }
  0x23   :  { %638 = shalt.err (!%p635_p1)
}
  0x24   :  { %s671_s1 = smov 128   ;;  %s672_s14 = smov 8  }
  0x25   :  { %37 = dma.hbm_to_vmem [thread:$0]  %s781_s2, 4480, %s32_s5, [#allocation6], %s671_s1, %s671_s1, %s672_s14  }
  0x26   :  { %661 = dma.done.wait [#allocation3], 128  }
  0x27   :  { %662 = vsyncadd [#allocation3], 4294967168 }
  0x28   :  { %663 = dma.done.wait [#allocation6], 4480  }
  0x29   :  { %664 = vsyncadd [#allocation6], 4294962816  ;;  %v673_v0 = vmov 0.0|0.0   ;;  %v674_v1 = vmov 0.0   ;;  %vm675_vm0 = vmmov 0   ;;  %vm86_vm1 = vcmask 64512  }
  0x2a   :  { %534 = vmatprep.subr.bf16.mxu1 %v673_v0  ;;  %452 = vmatprep.subr.mxu0 %v674_v1  ;;  %v48_v2 = vld [vmem:[#allocation5] sm:$0xff]  ;;  %v49_v3 = vld [vmem:[#allocation5 + $0x8] sm:$0xff]  ;;  %v50_v4 = vld [vmem:[#allocation5 + $0x10] sm:$0xff]  ;;  %vm160_vm2 = vcmask 130048  }
  0x2b   :  { %454 = vmatprep.mubr.msk.f32.mxu0 %vm675_vm0, %v674_v1  ;;  %461 = vmatprep.mubr.msk.f32.mxu1 %vm675_vm0, %v674_v1  ;;  %v535_v5 = vpack.c.bf16 %v49_v3, %v48_v2  ;;  %v47_v6 = vld [vmem:[#allocation2] sm:$0xff]  ;;  %v52_v8 = vld [vmem:[#allocation5 + $0x20] sm:$0xff]  ;;  %v53_v9 = vld [vmem:[#allocation5 + $0x28] sm:$0xff] }
  0x2c   :  { %453 = vmatpush3.msra.mxu0 %v50_v4  ;;  %v51_v7 = vld [vmem:[#allocation5 + $0x18] sm:$0xff]  ;;  %v54_v10 = vld [vmem:[#allocation5 + $0x30] sm:$0xff]  ;;  %v46_v11 = vld [vmem:[%s779_s0] sm:$0xff] }
  0x2d   :  { %455 = vmatmul.mubr.msk.f32.vlgmr.msra.gmra.mrb[0].mxu0 %vm86_vm1, %v47_v6  ;;  %537 = vmatprep.subr.bf16.mxu0 %v673_v0  ;;  %v538_v12 = vpack.c.bf16 %v52_v8, %v51_v7  ;;  %v541_v13 = vpack.c.bf16 %v54_v10, %v53_v9  ;;  %v55_v14 = vld [vmem:[#allocation5 + $0x38] sm:$0xff]  ;;  %v56_v15 = vld [vmem:[#allocation5 + $0x40] sm:$0xff]  ;;  %v57_v17 = vld [vmem:[#allocation5 + $0x48] sm:$0xff] }
  0x2e   :  { %536 = vmatpush3.bf16.msra.mxu1 %v535_v5  ;;  %496 = vmatprep.mubr.msk.f32.mxu0 %vm675_vm0, %v674_v1  ;;  %v544_v16 = vpack.c.bf16 %v56_v15, %v55_v14  ;;  %v58_v18 = vld [vmem:[#allocation5 + $0x50] sm:$0xff]  ;;  %v59_v20 = vld [vmem:[#allocation5 + $0x58] sm:$0xff]  ;;  %v60_v21 = vld [vmem:[#allocation5 + $0x60] sm:$0xff] }
  0x2f   :  { %561 = vmatprep.subr.bf16.mxu1 %v673_v0  ;;  %539 = vmatpush3.bf16.msra.mxu0 %v538_v12  ;;  %v547_v19 = vpack.c.bf16 %v58_v18, %v57_v17  ;;  %v550_v22 = vpack.c.bf16 %v60_v21, %v59_v20  ;;  %v61_v23 = vld [vmem:[#allocation5 + $0x68] sm:$0xff]  ;;  %v62_v24 = vld [vmem:[#allocation5 + $0x70] sm:$0xff]  ;;  %v63_v26 = vld [vmem:[#allocation5 + $0x78] sm:$0xff] }
  0x30   :  { %540 = vmatprep.subr.bf16.mxu0 %v673_v0  ;;  %v553_v25 = vpack.c.bf16 %v62_v24, %v61_v23  ;;  %v64_v27 = vld [vmem:[#allocation5 + $0x80] sm:$0xff]  ;;  %v65_v29 = vld [vmem:[#allocation5 + $0x88] sm:$0xff]  ;;  %v66_v30 = vld [vmem:[#allocation5 + $0x90] sm:$0xff] }
  0x31   :  { %462 = vmatmul.mubr.msk.f32.vlgmr.msra.gmra.mrb[0].mxu1 %vm160_vm2, %v46_v11  ;;  %v556_v28 = vpack.c.bf16 %v64_v27, %v63_v26  ;;  %v559_v31 = vpack.c.bf16 %v66_v30, %v65_v29  ;;  %v67_v32 = vld [vmem:[#allocation5 + $0x98] sm:$0xff]  ;;  %v68_v33 = vld [vmem:[#allocation5 + $0xa0] sm:$0xff]  ;;  %v69_v34 = vld [vmem:[#allocation5 + $0xa8] sm:$0xff] }
  0x32   :  { %531 = vmatprep.mubr.msk.f32.mxu1 %vm675_vm0, %v674_v1  ;;  %v562_v35 = vpack.c.bf16 %v68_v33, %v67_v32  ;;  %v70_v36 = vld [vmem:[#allocation5 + $0xb0] sm:$0xff]  ;;  %v71_v38 = vld [vmem:[#allocation5 + $0xb8] sm:$0xff]  ;;  %v72_v39 = vld [vmem:[#allocation5 + $0xc0] sm:$0xff] }
  0x33   :  { %542 = vmatpush3.bf16.msra.mxu0 %v541_v13  ;;  %v565_v37 = vpack.c.bf16 %v70_v36, %v69_v34  ;;  %v568_v40 = vpack.c.bf16 %v72_v39, %v71_v38  ;;  %v73_v41 = vld [vmem:[#allocation5 + $0xc8] sm:$0xff]  ;;  %v74_v42 = vld [vmem:[#allocation5 + $0xd0] sm:$0xff]  ;;  %v75_v44 = vld [vmem:[#allocation5 + $0xd8] sm:$0xff] }
  0x34   :  { %543 = vmatprep.subr.bf16.mxu0 %v673_v0  ;;  %563 = vmatpush3.bf16.msra.mxu1 %v562_v35  ;;  %v571_v43 = vpack.c.bf16 %v74_v42, %v73_v41  ;;  %v76_v45 = vld [vmem:[#allocation5 + $0xe0] sm:$0xff]  ;;  %v77_v47 = vld [vmem:[#allocation5 + $0xe8] sm:$0xff]  ;;  %v78_v48 = vld [vmem:[#allocation5 + $0xf0] sm:$0xff] }
  0x35   :  { %564 = vmatprep.subr.bf16.mxu1 %v673_v0  ;;  %v574_v46 = vpack.c.bf16 %v76_v45, %v75_v44  ;;  %v577_v49 = vpack.c.bf16 %v78_v48, %v77_v47  ;;  %v79_v50 = vld [vmem:[#allocation5 + $0xf8] sm:$0xff]  ;;  %v80_v51 = vld [vmem:[#allocation5 + $0x100] sm:$0xff]  ;;  %v410_v55 = vld [vmem:[%s782_s3] ss:$0 sm:$0xff] }
  0x36   :  { %v580_v52 = vpack.c.bf16 %v80_v51, %v79_v50  ;;  %v81_v61 = vld [vmem:[#allocation5 + $0x108] sm:$0xff]  ;;  %v82_v62 = vld [vmem:[#allocation5 + $0x110] sm:$0xff] }
  0x37   :  { %545 = vmatpush3.bf16.msra.mxu0 %v544_v16  ;;  %v583_v63 = vpack.c.bf16 %v82_v62, %v81_v61  ;;  %v412_v5 = vld [vmem:[%s782_s3 + $0x2] ss:$0 sm:$0xff] }
  0x38   :  { %546 = vmatprep.subr.bf16.mxu0 %v673_v0  ;;  %566 = vmatpush3.bf16.msra.mxu1 %v565_v37 }
  0x39   :  { %567 = vmatprep.subr.bf16.mxu1 %v673_v0 }
  0x3b   :  { %548 = vmatpush3.bf16.msra.mxu0 %v547_v19 }
  0x3c   :  { %549 = vmatprep.subr.bf16.mxu0 %v673_v0  ;;  %569 = vmatpush3.bf16.msra.mxu1 %v568_v40 }
  0x3d   :  { %570 = vmatprep.subr.bf16.mxu1 %v673_v0 }
  0x3f   :  { %551 = vmatpush3.bf16.msra.mxu0 %v550_v22 }
  0x40   :  { %552 = vmatprep.subr.bf16.mxu0 %v673_v0  ;;  %572 = vmatpush3.bf16.msra.mxu1 %v571_v43 }
  0x41   :  { %573 = vmatprep.subr.bf16.mxu1 %v673_v0 }
  0x43   :  { %554 = vmatpush3.bf16.msra.mxu0 %v553_v25 }
  0x44   :  { %555 = vmatprep.subr.bf16.mxu0 %v673_v0  ;;  %575 = vmatpush3.bf16.msra.mxu1 %v574_v46 }
  0x45   :  { %576 = vmatprep.subr.bf16.mxu1 %v673_v0 }
  0x47   :  { %557 = vmatpush3.bf16.msra.mxu0 %v556_v28 }
  0x48   :  { %558 = vmatprep.subr.bf16.mxu0 %v673_v0  ;;  %578 = vmatpush3.bf16.msra.mxu1 %v577_v49 }
  0x49   :  { %579 = vmatprep.subr.bf16.mxu1 %v673_v0 }
  0x4b   :  { %560 = vmatpush3.bf16.msra.mxu0 %v559_v31 }
  0x4c   :  { %581 = vmatpush3.bf16.msra.mxu1 %v580_v52 }
  0x4d   :  { %582 = vmatprep.subr.bf16.mxu1 %v673_v0  ;;  %v411_v0 = vld [vmem:[%s782_s3 + $0x1] ss:$0 sm:$0xff] }
  0x50   :  { %584 = vmatpush3.bf16.msra.mxu1 %v583_v63 }
 0x100   :  { %v156_v53 = vpop.f32.mrb[0].mxu0 }
 0x101   :  { %v456_v54 = vpop.f32.mrb[1].mxu0 }
 0x104   :  { %v230_v56 = vpop.f32.mrb[0].mxu1 }
 0x105   :  { %v231_v57 = vadd.f32 %v230_v56, %v156_v53  ;;  %v463_v58 = vpop.f32.mrb[1].mxu1 }
 0x107   :  { %v238_v59 = vadd.f32 %v410_v55, %v231_v57 }
 0x109   :  { %v239_v60 = vmax.f32 %v238_v59, 0.0 }
 0x10b   :  { %497 = vmatmul.mubr.f32.vlgmr.msra.gmra.mrb[2].mxu0 %v239_v60 }
 0x1de   :  { %v310_v1 = vpop.f32.mrb[2].mxu0 }
 0x1df   :  { %v311_v2 = vadd.f32 %v411_v0, %v310_v1  ;;  %v498_v3 = vpop.f32.mrb[3].mxu0 }
 0x1e1   :  { %v314_v4 = vmax.f32 %v311_v2, 0.0 }
 0x1e3   :  { %532 = vmatmul.mubr.f32.vlgmr.msra.gmra.mrb[2].mxu1 %v314_v4 }
 0x2b6   :  { %v385_v6 = vpop.f32.mrb[2].mxu1 }
 0x2b7   :  { %v386_v7 = vadd.f32 %v412_v5, %v385_v6  ;;  %v533_v8 = vpop.f32.mrb[3].mxu1 }
 0x2b9   :  { %389 = vst.msk [vmem:[#allocation7] sm:$0xff] %vm86_vm1, %v386_v7 }
 0x2ba   :  { %394 = vsyncadd [#allocation4], 96  ;;  %s676_s23 = smov [#allocation7]  }
 0x2bb   :  { %s395_s24 = sshll.u32 %s676_s23, 4  ;;  %s396_s24 = int_to_ptr.vmem [resolvable:$true] %s395_s24 }
 0x2bc   :  { %s639_s25 = scalar_lea.vmem %s396_s24, 32  ;;  %s643_s28 = scalar_lea.vmem %s396_s24, 128 }
 0x2bd   :  { %p640_p2 = scmp.ne.s32.totalorder %s396_s24, %s639_s25  ;;  %p644_p3 = scmp.lt.s32.totalorder %s396_s24, %s396_s24 }
 0x2be   :  { %p645_p4 = scmp.lt.s32.totalorder %s643_s28, %s639_s25 }
 0x2c0   :  { %p646_p5 = por %p645_p4, %p644_p3 }
 0x2c2   :  { %p647_p6 = pnand %p646_p5, %p640_p2 }
 0x2c4   :  { %650 = shalt.err (!%p647_p6)
}
 0x2c5   :  { %s651_s3 = scalar_lea.hbm %s783_s4, 32 }
 0x2c6   :  { %p652_p7 = scmp.ne.s32.totalorder %s783_s4, %s651_s3  ;;  %p655_p8 = scmp.lt.u32.totalorder %s651_s3, %s783_s4 }
 0x2c8   :  { %p657_p9 = pnand %p655_p8, %p652_p7 }
 0x2ca   :  { %660 = shalt.err (!%p657_p9)
}
 0x2cb   :  { %401 = dma.vmem_to_hbm [thread:$0]  %s396_s24, 32, %s783_s4, [#allocation4], %s668_s26, %s668_s26, %s669_s27  }
 0x2cc   :  { %665 = dma.done.wait [#allocation4], 128  }
 0x2cd   :  { %666 = vsyncadd [#allocation4], 4294967168 }
 0x2ce   :  { %405 = vsyncpa [#allocation3], 1 }
 0x2cf   :  { %406 = vsyncpa [#allocation6], 1 }
 0x2d0   :  { %407 = vsyncpa [#allocation4], 1 }

</bundles_post_ra>
